<compile_context>
chip_gen: v7x
topology: tpu7x:2x2x1
jax: 0.10.0
libtpu: 0.0.40
codegen_flags: <defaults>
</compile_context>

<pallas_src>
import jax
import jax.numpy as jnp
from jax.experimental import pallas as pl
from jax.experimental.pallas import tpu as pltpu


def _round_up(x, m):
    return (x + m - 1) // m * m


def _one_hot_kernel(idx_ref, out_ref):
    """out[r, :] = one_hot(min(idx[r], pe_size - 1), pe_size).

    idx_ref: (tile_n, 1)        int32 VMEM
    out_ref: (tile_n, pe_size)  VMEM (out_dtype)
    """
    pe_size = out_ref.shape[1]
    idx = jnp.minimum(idx_ref[...], pe_size - 1)                    # clamp(max=)
    lane = jax.lax.broadcasted_iota(jnp.int32, (1, pe_size), 1)     # (1, V)
    out_ref[...] = (lane == idx).astype(out_ref.dtype)              # (tile, V)


def one_hot_pe(position, pe_size, *, out_dtype=jnp.int32, max_tile_n=4096):
    """JAX/Pallas port of OneHotPE.forward."""
    pos = position
    # torch .squeeze(-1): drop a trailing size-1 dim if present, then flatten.
    if pos.ndim >= 2 and pos.shape[-1] == 1:
        pos = pos.reshape(pos.shape[:-1])
    pos = pos.reshape(-1)
    n = pos.shape[0]

    if pe_size == 0:
        # Empty (N, 0) output has no meaningful kernel; return directly.
        return jnp.zeros((n, 0), dtype=out_dtype)
    if n == 0:
        # Empty batch: no kernel launch (avoids a zero-size grid).
        return jnp.zeros((0, pe_size), dtype=out_dtype)

    idx = pos if pos.dtype == jnp.int32 else pos.astype(jnp.int32)
    idx2d = idx.reshape(n, 1)

    # Adaptive row tile: ~4 MiB per output block (8 MiB double-buffered),
    # multiple of 8 sublanes, never more rows than the (padded) batch needs.
    itemsize = jnp.dtype(out_dtype).itemsize
    row_bytes = max(pe_size * itemsize, 1)
    tile = max(8, min(max_tile_n, (4 << 20) // row_bytes))
    tile = max(8, tile - tile % 8)
    tile = min(tile, _round_up(n, 8))

    grid = (pl.cdiv(n, tile),)

    cost = pl.CostEstimate(
        flops=2 * n * pe_size,
        transcendentals=0,
        bytes_accessed=n * (pe_size * itemsize + 4),
    )

    return pl.pallas_call(
        _one_hot_kernel,
        out_shape=jax.ShapeDtypeStruct((n, pe_size), out_dtype),
        grid=grid,
        in_specs=[pl.BlockSpec((tile, 1), lambda i: (i, 0))],
        out_specs=pl.BlockSpec((tile, pe_size), lambda i: (i, 0)),
        compiler_params=pltpu.CompilerParams(
            dimension_semantics=("parallel",),
        ),
        cost_estimate=cost,
    )(idx2d)


class OneHotPE:
    """JAX/Pallas port of the PyTorch OneHotPE module."""

    def __init__(self, pe_size):
        self.pe_size = int(pe_size)

    def __call__(self, position):
        return one_hot_pe(position, self.pe_size)


def _reference(position, pe_size):
    pos = position
    if pos.ndim >= 2 and pos.shape[-1] == 1:
        pos = pos.reshape(pos.shape[:-1])
    pos = pos.reshape(-1)
    if pe_size == 0:
        return jnp.zeros((pos.shape[0], 0), dtype=jnp.int32)
    clamped = jnp.minimum(pos.astype(jnp.int32), pe_size - 1)
    return jax.nn.one_hot(clamped, pe_size, dtype=jnp.int32)


if __name__ == "__main__":
    key = jax.random.PRNGKey(0)

    # Positions come in as (N, 1) like the LayerDAG caller; include values
    # beyond pe_size - 1 so the clamp path is exercised.  N is deliberately
    # not a multiple of 8 so the partial-edge-block path is exercised too.
    n_rows = 300
    pe_size = 128                      # multiple of 128 -> lane-dense output
    position = jax.random.randint(
        key, (n_rows, 1), 0, pe_size + 40, dtype=jnp.int32
    )

    module = OneHotPE(pe_size)
    out = jax.block_until_ready(module(position))
    ref = _reference(position, pe_size)
    assert out.shape == (n_rows, pe_size), out.shape
    assert out.dtype == jnp.int32
    assert jnp.array_equal(out, ref), "one-hot mismatch vs reference"
    assert jnp.all(out.sum(axis=1) == 1)   # all inputs here are >= 0

    # Force a multi-step grid with a masked partial last block.
    out_tiled = jax.block_until_ready(one_hot_pe(position, pe_size, max_tile_n=64))
    assert jnp.array_equal(out_tiled, ref), "multi-tile mismatch vs reference"

    # Small non-multiple-of-tile N and non-128 pe_size (full-last-dim block).
    n_small, pe_small = 37, 20
    pos_small = jax.random.randint(
        jax.random.PRNGKey(1), (n_small, 1), 0, pe_small + 5, dtype=jnp.int32
    )
    out_small = jax.block_until_ready(one_hot_pe(pos_small, pe_small))
    assert out_small.shape == (n_small, pe_small)
    assert jnp.array_equal(out_small, _reference(pos_small, pe_small)), "small mismatch"

    # Narrow-dtype path (writeback-bound: int8 quarters bytes written).
    out_i8 = jax.block_until_ready(one_hot_pe(position, pe_size, out_dtype=jnp.int8))
    assert out_i8.dtype == jnp.int8
    assert jnp.array_equal(out_i8.astype(jnp.int32), ref), "int8 mismatch"

    # pe_size == 0 and n == 0 branches.
    assert OneHotPE(0)(position).shape == (n_rows, 0)
    assert one_hot_pe(jnp.zeros((0, 1), jnp.int32), 16).shape == (0, 16)

    print("KERNEL_OK")
</pallas_src>

<mosaic_0001>
module attributes {stable_mosaic.version = 11 : i64} {
  func.func @_one_hot_kernel(%arg0: i32, %arg1: memref<304x1xi32, #tpu.memory_space<vmem>>, %arg2: memref<304x128xi32, #tpu.memory_space<vmem>>) attributes {dimension_semantics = [#tpu.dimension_semantics<parallel>], iteration_bounds = array<i64: 1>, scalar_prefetch = 0 : i64, scratch_operands = 0 : i64, tpu.core_type = #tpu.core_type<tc>, window_params = [{transform_indices = @transform_0, window_bounds = array<i64: 304, 1>}, {transform_indices = @transform_1, window_bounds = array<i64: 304, 128>}]} {
    %c0 = arith.constant 0 : index
    %c0_0 = arith.constant 0 : index
    %0 = vector.load %arg1[%c0, %c0_0] : memref<304x1xi32, #tpu.memory_space<vmem>>, vector<304x1xi32>
    %c127_i32 = arith.constant 127 : i32
    %1 = vector.broadcast %c127_i32 : i32 to vector<304x1xi32>
    %2 = arith.minsi %0, %1 : vector<304x1xi32>
    %3 = tpu.iota {dimensions = array<i32: 1>} : vector<1x128xi32>
    %4 = vector.broadcast %3 : vector<1x128xi32> to vector<304x128xi32>
    %5 = vector.broadcast %2 : vector<304x1xi32> to vector<304x128xi32>
    %6 = arith.cmpi eq, %4, %5 : vector<304x128xi32>
    %7 = arith.extui %6 : vector<304x128xi1> to vector<304x128xi32>
    %c0_1 = arith.constant 0 : index
    %c0_2 = arith.constant 0 : index
    %8 = vector.load %arg2[%c0_1, %c0_2] : memref<304x128xi32, #tpu.memory_space<vmem>>, vector<304x128xi32>
    tpu.vector_store %arg2[%c0_1, %c0_2], %7 {strides = array<i32>} : memref<304x128xi32, #tpu.memory_space<vmem>>, vector<304x128xi32>,
    return
  }
  func.func @transform_0(%arg0: i32) -> (i32, i32) {
    %c0_i32 = arith.constant 0 : i32
    %c0_i32_0 = arith.constant 0 : i32
    return %arg0, %c0_i32 : i32, i32
  }
  func.func @transform_1(%arg0: i32) -> (i32, i32) {
    %c0_i32 = arith.constant 0 : i32
    %c0_i32_0 = arith.constant 0 : i32
    return %arg0, %c0_i32 : i32, i32
  }
}

</mosaic_0001>

<bundles_post_ra>
// kernel: tpu_custom_call.1
= control target key start
LH: loop header
LB: loop body
LE: loop exit
PB: predicated region body
PF: predicated region fallthrough
CT: control target
= control target key end

     0   :  { %v399_v3 = vmov 0   ;;  %s619_s0 = inlined_call_operand.vmem [shape: s32[300,1], index: 0, kind: input, shape index: {}]   ;;  %s620_s1 = inlined_call_operand.hbm [shape: s32[300,128], index: 1, kind: output, shape index: {}]  }
   0x1   :  { %v11_v0 = vld [vmem:[%s619_s0 + $0x10] sm:$0xff]  ;;  %v9_v1 = vld [vmem:[%s619_s0] sm:$0xff]  ;;  %v12_v2 = vld [vmem:[%s619_s0 + $0x18] sm:$0xff]  ;;  %374 = vset.pattern.permute.xlu1 %v399_v3  ;;  %373 = vset.pattern.permute.xlu0 %v399_v3 }
   0x2   :  { %vm51_vm0 = vcmp.lt.s32.totalorder %v11_v0, 127  ;;  %vm47_vm1 = vcmp.lt.s32.totalorder %v9_v1, 127  ;;  %vm53_vm2 = vcmp.lt.s32.totalorder %v12_v2, 127  ;;  %v10_v4 = vld [vmem:[%s619_s0 + $0x8] sm:$0xff]  ;;  %v13_v8 = vld [vmem:[%s619_s0 + $0x20] sm:$0xff]  ;;  %v16_v11 = vld [vmem:[%s619_s0 + $0x38] sm:$0xff] }
   0x3   :  { %v52_v5 = vsel %vm51_vm0, %v11_v0, 127  ;;  %v48_v6 = vsel %vm47_vm1, %v9_v1, 127  ;;  %vm49_vm3 = vcmp.lt.s32.totalorder %v10_v4, 127  ;;  %v14_v7 = vld [vmem:[%s619_s0 + $0x28] sm:$0xff]  ;;  %v54_v9 = vsel %vm53_vm2, %v12_v2, 127  ;;  %v15_v12 = vld [vmem:[%s619_s0 + $0x30] sm:$0xff] }
   0x4   :  { %132 = vperm.xlu1 %374, %v52_v5   ;;  %126 = vperm.xlu0 %373, %v48_v6   ;;  %v50_v10 = vsel %vm49_vm3, %v10_v4, 127  ;;  %vm57_vm4 = vcmp.lt.s32.totalorder %v14_v7, 127  ;;  %vm55_vm5 = vcmp.lt.s32.totalorder %v13_v8, 127  ;;  %vm61_vm6 = vcmp.lt.s32.totalorder %v16_v11, 127  ;;  %v18_v15 = vld [vmem:[%s619_s0 + $0x48] sm:$0xff]  ;;  %v17_v16 = vld [vmem:[%s619_s0 + $0x40] sm:$0xff] }
   0x5   :  { %v58_v13 = vsel %vm57_vm4, %v14_v7, 127  ;;  %v56_v14 = vsel %vm55_vm5, %v13_v8, 127  ;;  %vm59_vm7 = vcmp.lt.s32.totalorder %v15_v12, 127  ;;  %v62_v17 = vsel %vm61_vm6, %v16_v11, 127  ;;  %v20_v19 = vld [vmem:[%s619_s0 + $0x58] sm:$0xff]  ;;  %v19_v20 = vld [vmem:[%s619_s0 + $0x50] sm:$0xff] }
   0x6   :  { %v60_v18 = vsel %vm59_vm7, %v15_v12, 127  ;;  %vm65_vm8 = vcmp.lt.s32.totalorder %v18_v15, 127  ;;  %vm63_vm9 = vcmp.lt.s32.totalorder %v17_v16, 127  ;;  %vm69_vm10 = vcmp.lt.s32.totalorder %v20_v19, 127  ;;  %v22_v23 = vld [vmem:[%s619_s0 + $0x68] sm:$0xff]  ;;  %v21_v24 = vld [vmem:[%s619_s0 + $0x60] sm:$0xff] }
   0x7   :  { %v66_v21 = vsel %vm65_vm8, %v18_v15, 127  ;;  %v64_v22 = vsel %vm63_vm9, %v17_v16, 127  ;;  %vm67_vm11 = vcmp.lt.s32.totalorder %v19_v20, 127 }
   0x8   :  { %135 = vperm.xlu1 %374, %v54_v9   ;;  %129 = vperm.xlu0 %373, %v50_v10  }
   0xc   :  { %141 = vperm.xlu1 %374, %v58_v13   ;;  %138 = vperm.xlu0 %373, %v56_v14  }
  0x10   :  { %147 = vperm.xlu1 %374, %v62_v17   ;;  %144 = vperm.xlu0 %373, %v60_v18  }
  0x11   :  { %6 = vsyncpa [#allocation3], 0  ;;  %v70_v25 = vsel %vm69_vm10, %v20_v19, 127  ;;  %v68_v26 = vsel %vm67_vm11, %v19_v20, 127  ;;  %vm73_vm12 = vcmp.lt.s32.totalorder %v22_v23, 127  ;;  %vm71_vm13 = vcmp.lt.s32.totalorder %v21_v24, 127 }
  0x12   :  { %v24_v27 = vld [vmem:[%s619_s0 + $0x78] sm:$0xff]  ;;  %v23_v28 = vld [vmem:[%s619_s0 + $0x70] sm:$0xff]  ;;  %v74_v29 = vsel %vm73_vm12, %v22_v23, 127  ;;  %v72_v30 = vsel %vm71_vm13, %v21_v24, 127  ;;  %v26_v31 = vld [vmem:[%s619_s0 + $0x88] sm:$0xff]  ;;  %v123_v14 = vlaneseq }
  0x13   :  { %vm77_vm14 = vcmp.lt.s32.totalorder %v24_v27, 127  ;;  %vm75_vm15 = vcmp.lt.s32.totalorder %v23_v28, 127  ;;  %v25_v32 = vld [vmem:[%s619_s0 + $0x80] sm:$0xff]  ;;  %vm81_vm0 = vcmp.lt.s32.totalorder %v26_v31, 127  ;;  %v28_v35 = vld [vmem:[%s619_s0 + $0x98] sm:$0xff]  ;;  %v27_v36 = vld [vmem:[%s619_s0 + $0x90] sm:$0xff] }
  0x14   :  { %153 = vperm.xlu1 %374, %v66_v21   ;;  %150 = vperm.xlu0 %373, %v64_v22   ;;  %v78_v33 = vsel %vm77_vm14, %v24_v27, 127  ;;  %v76_v34 = vsel %vm75_vm15, %v23_v28, 127  ;;  %vm79_vm1 = vcmp.lt.s32.totalorder %v25_v32, 127  ;;  %v82_v37 = vsel %vm81_vm0, %v26_v31, 127  ;;  %v30_v39 = vld [vmem:[%s619_s0 + $0xa8] sm:$0xff]  ;;  %v29_v40 = vld [vmem:[%s619_s0 + $0xa0] sm:$0xff] }
  0x15   :  { %v80_v38 = vsel %vm79_vm1, %v25_v32, 127  ;;  %vm85_vm2 = vcmp.lt.s32.totalorder %v28_v35, 127  ;;  %vm83_vm3 = vcmp.lt.s32.totalorder %v27_v36, 127  ;;  %vm89_vm4 = vcmp.lt.s32.totalorder %v30_v39, 127  ;;  %v32_v43 = vld [vmem:[%s619_s0 + $0xb8] sm:$0xff]  ;;  %v31_v44 = vld [vmem:[%s619_s0 + $0xb0] sm:$0xff] }
  0x16   :  { %v86_v41 = vsel %vm85_vm2, %v28_v35, 127  ;;  %v84_v42 = vsel %vm83_vm3, %v27_v36, 127  ;;  %vm87_vm5 = vcmp.lt.s32.totalorder %v29_v40, 127  ;;  %v90_v45 = vsel %vm89_vm4, %v30_v39, 127  ;;  %v34_v47 = vld [vmem:[%s619_s0 + $0xc8] sm:$0xff]  ;;  %v33_v48 = vld [vmem:[%s619_s0 + $0xc0] sm:$0xff] }
  0x17   :  { %v88_v46 = vsel %vm87_vm5, %v29_v40, 127  ;;  %vm93_vm6 = vcmp.lt.s32.totalorder %v32_v43, 127  ;;  %vm91_vm7 = vcmp.lt.s32.totalorder %v31_v44, 127  ;;  %vm97_vm8 = vcmp.lt.s32.totalorder %v34_v47, 127  ;;  %v36_v51 = vld [vmem:[%s619_s0 + $0xd8] sm:$0xff]  ;;  %v35_v52 = vld [vmem:[%s619_s0 + $0xd0] sm:$0xff] }
  0x18   :  { %159 = vperm.xlu1 %374, %v70_v25   ;;  %156 = vperm.xlu0 %373, %v68_v26   ;;  %v94_v49 = vsel %vm93_vm6, %v32_v43, 127  ;;  %v92_v50 = vsel %vm91_vm7, %v31_v44, 127  ;;  %vm95_vm9 = vcmp.lt.s32.totalorder %v33_v48, 127  ;;  %v98_v53 = vsel %vm97_vm8, %v34_v47, 127  ;;  %v38_v55 = vld [vmem:[%s619_s0 + $0xe8] sm:$0xff]  ;;  %v37_v56 = vld [vmem:[%s619_s0 + $0xe0] sm:$0xff] }
  0x19   :  { %v96_v54 = vsel %vm95_vm9, %v33_v48, 127  ;;  %vm101_vm10 = vcmp.lt.s32.totalorder %v36_v51, 127  ;;  %vm99_vm11 = vcmp.lt.s32.totalorder %v35_v52, 127  ;;  %vm105_vm12 = vcmp.lt.s32.totalorder %v38_v55, 127  ;;  %v40_v59 = vld [vmem:[%s619_s0 + $0xf8] sm:$0xff]  ;;  %v39_v60 = vld [vmem:[%s619_s0 + $0xf0] sm:$0xff] }
  0x1a   :  { %v102_v57 = vsel %vm101_vm10, %v36_v51, 127  ;;  %v100_v58 = vsel %vm99_vm11, %v35_v52, 127  ;;  %vm103_vm13 = vcmp.lt.s32.totalorder %v37_v56, 127  ;;  %v106_v61 = vsel %vm105_vm12, %v38_v55, 127  ;;  %v42_v63 = vld [vmem:[%s619_s0 + $0x108] sm:$0xff]  ;;  %v41_v0 = vld [vmem:[%s619_s0 + $0x100] sm:$0xff] }
  0x1b   :  { %v104_v62 = vsel %vm103_vm13, %v37_v56, 127  ;;  %vm109_vm14 = vcmp.lt.s32.totalorder %v40_v59, 127  ;;  %vm107_vm15 = vcmp.lt.s32.totalorder %v39_v60, 127  ;;  %vm113_vm0 = vcmp.lt.s32.totalorder %v42_v63, 127  ;;  %v44_v4 = vld [vmem:[%s619_s0 + $0x118] sm:$0xff]  ;;  %v43_v5 = vld [vmem:[%s619_s0 + $0x110] sm:$0xff] }
  0x1c   :  { %165 = vperm.xlu1 %374, %v74_v29   ;;  %162 = vperm.xlu0 %373, %v72_v30   ;;  %v110_v1 = vsel %vm109_vm14, %v40_v59, 127  ;;  %v108_v2 = vsel %vm107_vm15, %v39_v60, 127  ;;  %vm111_vm1 = vcmp.lt.s32.totalorder %v41_v0, 127  ;;  %v114_v6 = vsel %vm113_vm0, %v42_v63, 127  ;;  %v46_v8 = vld [vmem:[%s619_s0 + $0x128] sm:$0xff]  ;;  %v45_v9 = vld [vmem:[%s619_s0 + $0x120] sm:$0xff] }
  0x1d   :  { %v112_v7 = vsel %vm111_vm1, %v41_v0, 127  ;;  %vm117_vm2 = vcmp.lt.s32.totalorder %v44_v4, 127  ;;  %vm115_vm3 = vcmp.lt.s32.totalorder %v43_v5, 127  ;;  %vm121_vm4 = vcmp.lt.s32.totalorder %v46_v8, 127  ;;  %s400_s0 = smov [#allocation2]  }
  0x1e   :  { %v118_v10 = vsel %vm117_vm2, %v44_v4, 127  ;;  %v116_v11 = vsel %vm115_vm3, %v43_v5, 127  ;;  %vm119_vm5 = vcmp.lt.s32.totalorder %v45_v9, 127  ;;  %v122_v12 = vsel %vm121_vm4, %v46_v8, 127  ;;  %s358_s24 = sshll.u32 %s400_s0, 4  ;;  %s359_s24 = int_to_ptr.vmem [resolvable:$true] %s358_s24 }
  0x1f   :  { %v120_v13 = vsel %vm119_vm5, %v45_v9, 127  ;;  %v529_v15 = vand.u32 127, %v123_v14  ;;  %s375_s25 = scalar_lea.vmem %s359_s24, 4864  ;;  %p380_p1 = scmp.lt.s32.totalorder %s359_s24, %s359_s24 }
  0x20   :  { %171 = vperm.xlu1 %374, %v78_v33   ;;  %168 = vperm.xlu0 %373, %v76_v34   ;;  %p376_p0 = scmp.ne.s32.totalorder %s359_s24, %s375_s25  ;;  %p381_p2 = scmp.lt.s32.totalorder %s375_s25, %s375_s25 }
  0x22   :  { %p382_p3 = por %p381_p2, %p380_p1 }
  0x24   :  { %177 = vperm.xlu1 %374, %v82_v37   ;;  %174 = vperm.xlu0 %373, %v80_v38   ;;  %p383_p4 = pnand %p382_p3, %p376_p0 }
  0x28   :  { %183 = vperm.xlu1 %374, %v86_v41   ;;  %180 = vperm.xlu0 %373, %v84_v42  }
  0x2c   :  { %189 = vperm.xlu1 %374, %v90_v45   ;;  %186 = vperm.xlu0 %373, %v88_v46  }
  0x30   :  { %195 = vperm.xlu1 %374, %v94_v49   ;;  %192 = vperm.xlu0 %373, %v92_v50  }
  0x34   :  { %201 = vperm.xlu1 %374, %v98_v53   ;;  %198 = vperm.xlu0 %373, %v96_v54  }
  0x38   :  { %207 = vperm.xlu1 %374, %v102_v57   ;;  %204 = vperm.xlu0 %373, %v100_v58  }
  0x3c   :  { %213 = vperm.xlu1 %374, %v106_v61   ;;  %210 = vperm.xlu0 %373, %v104_v62  }
  0x40   :  { %219 = vperm.xlu1 %374, %v110_v1   ;;  %216 = vperm.xlu0 %373, %v108_v2  }
  0x44   :  { %225 = vperm.xlu1 %374, %v114_v6   ;;  %222 = vperm.xlu0 %373, %v112_v7  }
  0x48   :  { %231 = vperm.xlu1 %374, %v118_v10   ;;  %228 = vperm.xlu0 %373, %v116_v11  }
  0x4c   :  { %237 = vperm.xlu1 %374, %v122_v12   ;;  %234 = vperm.xlu0 %373, %v120_v13  }
  0x83   :  { %v133_v16 = vpop.permute.xlu1 %132  ;;  %v127_v17 = vpop.permute.xlu0 %126 }
  0x84   :  { %vm241_vm6 = vcmp.eq.s32.totalorder %v529_v15, %v133_v16  ;;  %vm239_vm7 = vcmp.eq.s32.totalorder %v529_v15, %v127_v17 }
  0x85   :  { %v279_v18 = vsel %vm241_vm6, 1, %v399_v3  ;;  %v277_v19 = vsel %vm239_vm7, 1, %v399_v3 }
  0x86   :  { %317 = vst [vmem:[#allocation2 + $0x10] sm:$0xff] %v279_v18  ;;  %315 = vst [vmem:[#allocation2] sm:$0xff] %v277_v19 }
  0x87   :  { %v136_v20 = vpop.permute.xlu1 %135  ;;  %v130_v21 = vpop.permute.xlu0 %129 }
  0x88   :  { %vm242_vm8 = vcmp.eq.s32.totalorder %v529_v15, %v136_v20  ;;  %vm240_vm9 = vcmp.eq.s32.totalorder %v529_v15, %v130_v21 }
  0x89   :  { %v280_v22 = vsel %vm242_vm8, 1, %v399_v3  ;;  %v278_v23 = vsel %vm240_vm9, 1, %v399_v3 }
  0x8a   :  { %318 = vst [vmem:[#allocation2 + $0x18] sm:$0xff] %v280_v22  ;;  %316 = vst [vmem:[#allocation2 + $0x8] sm:$0xff] %v278_v23 }
  0x8b   :  { %v142_v24 = vpop.permute.xlu1 %141  ;;  %v139_v25 = vpop.permute.xlu0 %138 }
  0x8c   :  { %vm244_vm10 = vcmp.eq.s32.totalorder %v529_v15, %v142_v24  ;;  %vm243_vm11 = vcmp.eq.s32.totalorder %v529_v15, %v139_v25 }
  0x8d   :  { %v282_v26 = vsel %vm244_vm10, 1, %v399_v3  ;;  %v281_v27 = vsel %vm243_vm11, 1, %v399_v3 }
  0x8e   :  { %320 = vst [vmem:[#allocation2 + $0x28] sm:$0xff] %v282_v26  ;;  %319 = vst [vmem:[#allocation2 + $0x20] sm:$0xff] %v281_v27 }
  0x8f   :  { %v148_v28 = vpop.permute.xlu1 %147  ;;  %v145_v29 = vpop.permute.xlu0 %144 }
  0x90   :  { %vm246_vm12 = vcmp.eq.s32.totalorder %v529_v15, %v148_v28  ;;  %vm245_vm13 = vcmp.eq.s32.totalorder %v529_v15, %v145_v29 }
  0x91   :  { %v284_v30 = vsel %vm246_vm12, 1, %v399_v3  ;;  %v283_v31 = vsel %vm245_vm13, 1, %v399_v3 }
  0x92   :  { %322 = vst [vmem:[#allocation2 + $0x38] sm:$0xff] %v284_v30  ;;  %321 = vst [vmem:[#allocation2 + $0x30] sm:$0xff] %v283_v31 }
  0x93   :  { %v154_v32 = vpop.permute.xlu1 %153  ;;  %v151_v33 = vpop.permute.xlu0 %150 }
  0x94   :  { %vm248_vm14 = vcmp.eq.s32.totalorder %v529_v15, %v154_v32  ;;  %vm247_vm15 = vcmp.eq.s32.totalorder %v529_v15, %v151_v33 }
  0x95   :  { %v286_v34 = vsel %vm248_vm14, 1, %v399_v3  ;;  %v285_v35 = vsel %vm247_vm15, 1, %v399_v3 }
  0x96   :  { %324 = vst [vmem:[#allocation2 + $0x48] sm:$0xff] %v286_v34  ;;  %323 = vst [vmem:[#allocation2 + $0x40] sm:$0xff] %v285_v35 }
  0x97   :  { %v160_v36 = vpop.permute.xlu1 %159  ;;  %v157_v37 = vpop.permute.xlu0 %156 }
  0x98   :  { %vm250_vm0 = vcmp.eq.s32.totalorder %v529_v15, %v160_v36  ;;  %vm249_vm1 = vcmp.eq.s32.totalorder %v529_v15, %v157_v37 }
  0x99   :  { %v288_v38 = vsel %vm250_vm0, 1, %v399_v3  ;;  %v287_v39 = vsel %vm249_vm1, 1, %v399_v3 }
  0x9a   :  { %326 = vst [vmem:[#allocation2 + $0x58] sm:$0xff] %v288_v38  ;;  %325 = vst [vmem:[#allocation2 + $0x50] sm:$0xff] %v287_v39 }
  0x9b   :  { %v166_v40 = vpop.permute.xlu1 %165  ;;  %v163_v41 = vpop.permute.xlu0 %162 }
  0x9c   :  { %vm252_vm2 = vcmp.eq.s32.totalorder %v529_v15, %v166_v40  ;;  %vm251_vm3 = vcmp.eq.s32.totalorder %v529_v15, %v163_v41 }
  0x9d   :  { %v290_v42 = vsel %vm252_vm2, 1, %v399_v3  ;;  %v289_v43 = vsel %vm251_vm3, 1, %v399_v3 }
  0x9e   :  { %328 = vst [vmem:[#allocation2 + $0x68] sm:$0xff] %v290_v42  ;;  %327 = vst [vmem:[#allocation2 + $0x60] sm:$0xff] %v289_v43 }
  0x9f   :  { %v172_v44 = vpop.permute.xlu1 %171  ;;  %v169_v45 = vpop.permute.xlu0 %168 }
  0xa0   :  { %vm254_vm4 = vcmp.eq.s32.totalorder %v529_v15, %v172_v44  ;;  %vm253_vm5 = vcmp.eq.s32.totalorder %v529_v15, %v169_v45 }
  0xa1   :  { %v292_v46 = vsel %vm254_vm4, 1, %v399_v3  ;;  %v291_v47 = vsel %vm253_vm5, 1, %v399_v3 }
  0xa2   :  { %330 = vst [vmem:[#allocation2 + $0x78] sm:$0xff] %v292_v46  ;;  %329 = vst [vmem:[#allocation2 + $0x70] sm:$0xff] %v291_v47 }
  0xa3   :  { %v178_v48 = vpop.permute.xlu1 %177  ;;  %v175_v49 = vpop.permute.xlu0 %174 }
  0xa4   :  { %vm256_vm6 = vcmp.eq.s32.totalorder %v529_v15, %v178_v48  ;;  %vm255_vm7 = vcmp.eq.s32.totalorder %v529_v15, %v175_v49 }
  0xa5   :  { %v294_v50 = vsel %vm256_vm6, 1, %v399_v3  ;;  %v293_v51 = vsel %vm255_vm7, 1, %v399_v3 }
  0xa6   :  { %332 = vst [vmem:[#allocation2 + $0x88] sm:$0xff] %v294_v50  ;;  %331 = vst [vmem:[#allocation2 + $0x80] sm:$0xff] %v293_v51 }
  0xa7   :  { %v184_v52 = vpop.permute.xlu1 %183  ;;  %v181_v53 = vpop.permute.xlu0 %180 }
  0xa8   :  { %vm258_vm8 = vcmp.eq.s32.totalorder %v529_v15, %v184_v52  ;;  %vm257_vm9 = vcmp.eq.s32.totalorder %v529_v15, %v181_v53 }
  0xa9   :  { %v296_v54 = vsel %vm258_vm8, 1, %v399_v3  ;;  %v295_v55 = vsel %vm257_vm9, 1, %v399_v3 }
  0xaa   :  { %334 = vst [vmem:[#allocation2 + $0x98] sm:$0xff] %v296_v54  ;;  %333 = vst [vmem:[#allocation2 + $0x90] sm:$0xff] %v295_v55 }
  0xab   :  { %v190_v56 = vpop.permute.xlu1 %189  ;;  %v187_v57 = vpop.permute.xlu0 %186 }
  0xac   :  { %vm260_vm10 = vcmp.eq.s32.totalorder %v529_v15, %v190_v56  ;;  %vm259_vm11 = vcmp.eq.s32.totalorder %v529_v15, %v187_v57 }
  0xad   :  { %v298_v58 = vsel %vm260_vm10, 1, %v399_v3  ;;  %v297_v59 = vsel %vm259_vm11, 1, %v399_v3 }
  0xae   :  { %336 = vst [vmem:[#allocation2 + $0xa8] sm:$0xff] %v298_v58  ;;  %335 = vst [vmem:[#allocation2 + $0xa0] sm:$0xff] %v297_v59 }
  0xaf   :  { %v196_v60 = vpop.permute.xlu1 %195  ;;  %v193_v61 = vpop.permute.xlu0 %192 }
  0xb0   :  { %vm262_vm12 = vcmp.eq.s32.totalorder %v529_v15, %v196_v60  ;;  %vm261_vm13 = vcmp.eq.s32.totalorder %v529_v15, %v193_v61 }
  0xb1   :  { %v300_v62 = vsel %vm262_vm12, 1, %v399_v3  ;;  %v299_v63 = vsel %vm261_vm13, 1, %v399_v3 }
  0xb2   :  { %338 = vst [vmem:[#allocation2 + $0xb8] sm:$0xff] %v300_v62  ;;  %337 = vst [vmem:[#allocation2 + $0xb0] sm:$0xff] %v299_v63 }
  0xb3   :  { %v202_v0 = vpop.permute.xlu1 %201  ;;  %v199_v1 = vpop.permute.xlu0 %198 }
  0xb4   :  { %vm264_vm14 = vcmp.eq.s32.totalorder %v529_v15, %v202_v0  ;;  %vm263_vm15 = vcmp.eq.s32.totalorder %v529_v15, %v199_v1 }
  0xb5   :  { %v302_v2 = vsel %vm264_vm14, 1, %v399_v3  ;;  %v301_v4 = vsel %vm263_vm15, 1, %v399_v3 }
  0xb6   :  { %340 = vst [vmem:[#allocation2 + $0xc8] sm:$0xff] %v302_v2  ;;  %339 = vst [vmem:[#allocation2 + $0xc0] sm:$0xff] %v301_v4 }
  0xb7   :  { %v208_v5 = vpop.permute.xlu1 %207  ;;  %v205_v6 = vpop.permute.xlu0 %204 }
  0xb8   :  { %vm266_vm0 = vcmp.eq.s32.totalorder %v529_v15, %v208_v5  ;;  %vm265_vm1 = vcmp.eq.s32.totalorder %v529_v15, %v205_v6 }
  0xb9   :  { %v304_v7 = vsel %vm266_vm0, 1, %v399_v3  ;;  %v303_v8 = vsel %vm265_vm1, 1, %v399_v3 }
  0xba   :  { %342 = vst [vmem:[#allocation2 + $0xd8] sm:$0xff] %v304_v7  ;;  %341 = vst [vmem:[#allocation2 + $0xd0] sm:$0xff] %v303_v8 }
  0xbb   :  { %v214_v9 = vpop.permute.xlu1 %213  ;;  %v211_v10 = vpop.permute.xlu0 %210 }
  0xbc   :  { %vm268_vm2 = vcmp.eq.s32.totalorder %v529_v15, %v214_v9  ;;  %vm267_vm3 = vcmp.eq.s32.totalorder %v529_v15, %v211_v10 }
  0xbd   :  { %v306_v11 = vsel %vm268_vm2, 1, %v399_v3  ;;  %v305_v12 = vsel %vm267_vm3, 1, %v399_v3 }
  0xbe   :  { %344 = vst [vmem:[#allocation2 + $0xe8] sm:$0xff] %v306_v11  ;;  %343 = vst [vmem:[#allocation2 + $0xe0] sm:$0xff] %v305_v12 }
  0xbf   :  { %v220_v13 = vpop.permute.xlu1 %219  ;;  %v217_v14 = vpop.permute.xlu0 %216 }
  0xc0   :  { %vm270_vm4 = vcmp.eq.s32.totalorder %v529_v15, %v220_v13  ;;  %vm269_vm5 = vcmp.eq.s32.totalorder %v529_v15, %v217_v14 }
  0xc1   :  { %v308_v16 = vsel %vm270_vm4, 1, %v399_v3  ;;  %v307_v17 = vsel %vm269_vm5, 1, %v399_v3 }
  0xc2   :  { %346 = vst [vmem:[#allocation2 + $0xf8] sm:$0xff] %v308_v16  ;;  %345 = vst [vmem:[#allocation2 + $0xf0] sm:$0xff] %v307_v17 }
  0xc3   :  { %v226_v18 = vpop.permute.xlu1 %225  ;;  %v223_v19 = vpop.permute.xlu0 %222 }
  0xc4   :  { %vm272_vm6 = vcmp.eq.s32.totalorder %v529_v15, %v226_v18  ;;  %vm271_vm7 = vcmp.eq.s32.totalorder %v529_v15, %v223_v19 }
  0xc5   :  { %v310_v20 = vsel %vm272_vm6, 1, %v399_v3  ;;  %v309_v21 = vsel %vm271_vm7, 1, %v399_v3 }
  0xc6   :  { %348 = vst [vmem:[#allocation2 + $0x108] sm:$0xff] %v310_v20  ;;  %347 = vst [vmem:[#allocation2 + $0x100] sm:$0xff] %v309_v21 }
  0xc7   :  { %v232_v22 = vpop.permute.xlu1 %231  ;;  %v229_v23 = vpop.permute.xlu0 %228 }
  0xc8   :  { %vm274_vm8 = vcmp.eq.s32.totalorder %v529_v15, %v232_v22  ;;  %vm273_vm9 = vcmp.eq.s32.totalorder %v529_v15, %v229_v23 }
  0xc9   :  { %v312_v24 = vsel %vm274_vm8, 1, %v399_v3  ;;  %v311_v25 = vsel %vm273_vm9, 1, %v399_v3 }
  0xca   :  { %350 = vst [vmem:[#allocation2 + $0x118] sm:$0xff] %v312_v24  ;;  %349 = vst [vmem:[#allocation2 + $0x110] sm:$0xff] %v311_v25 }
  0xcb   :  { %v238_v26 = vpop.permute.xlu1 %237  ;;  %v235_v27 = vpop.permute.xlu0 %234 }
  0xcc   :  { %vm276_vm10 = vcmp.eq.s32.totalorder %v529_v15, %v238_v26  ;;  %vm275_vm11 = vcmp.eq.s32.totalorder %v529_v15, %v235_v27 }
  0xcd   :  { %v314_v28 = vsel %vm276_vm10, 1, %v399_v3  ;;  %v313_v29 = vsel %vm275_vm11, 1, %v399_v3 }
  0xce   :  { %352 = vst [vmem:[#allocation2 + $0x128] sm:$0xff] %v314_v28  ;;  %351 = vst [vmem:[#allocation2 + $0x120] sm:$0xff] %v313_v29 }
  0xcf   :  { %386 = shalt.err (!%p383_p4)
}
  0xd0   :  { %s387_s28 = scalar_lea.hbm %s620_s1, 4864 }
  0xd1   :  { %p388_p5 = scmp.ne.s32.totalorder %s620_s1, %s387_s28  ;;  %p391_p6 = scmp.lt.u32.totalorder %s387_s28, %s620_s1 }
  0xd3   :  { %p393_p7 = pnand %p391_p6, %p388_p5 }
  0xd5   :  { %396 = shalt.err (!%p393_p7)
}
  0xd6   :  { %s401_s4 = smov 128   ;;  %s402_s5 = smov 8  }
  0xd7   :  { %364 = dma.vmem_to_hbm [thread:$0]  %s359_s24, 4864, %s620_s1, [#allocation3], %s401_s4, %s401_s4, %s402_s5  }
  0xd8   :  { %397 = dma.done.wait [#allocation3], 4864  }
  0xd9   :  { %398 = vsyncadd [#allocation3], 4294962432 }
  0xda   :  { %368 = vsyncpa [#allocation3], 1 }

</bundles_post_ra>
